<compile_context>
chip_gen: v7x
topology: tpu7x:2x2x1
jax: 0.10.0
libtpu: 0.0.40
codegen_flags: <defaults>
</compile_context>

<pallas_src>
import functools

import jax
import jax.numpy as jnp
from jax.experimental import pallas as pl
from jax.experimental.pallas import tpu as pltpu

DROP_P = 0.2
IN_F = 6
H1, H2, H3 = 128, 256, 64
N_OUT = 5
OUT_PAD = 128  # lane-dense padded output width


def _dqn_kernel(training, x_ref, *refs):
    if training:
        (m1_ref, m2_ref, m3_ref,
         w1_ref, b1_ref, w2_ref, b2_ref,
         w3_ref, b3_ref, w4_ref, b4_ref, o_ref) = refs
    else:
        (w1_ref, b1_ref, w2_ref, b2_ref,
         w3_ref, b3_ref, w4_ref, b4_ref, o_ref) = refs
        m1_ref = m2_ref = m3_ref = None

    # --- layer 1: Linear(6,128) + ReLU + Dropout ---
    h = jnp.dot(x_ref[...].astype(jnp.bfloat16), w1_ref[...],
                preferred_element_type=jnp.float32) + b1_ref[...]
    h = jnp.maximum(h, 0.0)
    if training:
        h = h * m1_ref[...].astype(jnp.float32)

    # --- layer 2: Linear(128,256) + ReLU + Dropout ---
    h = jnp.dot(h.astype(jnp.bfloat16), w2_ref[...],
                preferred_element_type=jnp.float32) + b2_ref[...]
    h = jnp.maximum(h, 0.0)
    if training:
        h = h * m2_ref[...].astype(jnp.float32)

    # --- layer 3: Linear(256,64) + ReLU + Dropout ---
    h = jnp.dot(h.astype(jnp.bfloat16), w3_ref[...],
                preferred_element_type=jnp.float32) + b3_ref[...]
    h = jnp.maximum(h, 0.0)
    if training:
        h = h * m3_ref[...].astype(jnp.float32)

    # --- layer 4: Linear(64, 5->128 padded), lane-dense store ---
    h = jnp.dot(h.astype(jnp.bfloat16), w4_ref[...],
                preferred_element_type=jnp.float32) + b4_ref[...]
    o_ref[...] = h.astype(o_ref.dtype)


def make_dropout_masks(key, batch):
    """Pre-scaled inverted-dropout masks: values in {0, 1/(1-p)} as bf16."""
    k1, k2, k3 = jax.random.split(key, 3)

    def mk(k, d):
        keep = jax.random.bernoulli(k, 1.0 - DROP_P, (batch, d))
        return keep.astype(jnp.bfloat16) * 1.25  # 1/(1-0.2), exact in bf16

    return mk(k1, H1), mk(k2, H2), mk(k3, H3)


def dqn_forward(x, params, *, dropout_key=None, training=True, tile_b=256):
    """DQN forward as a single batch-gridded Pallas TPU kernel.

    x: (B, 6) float32.  Returns (B, 5) float32.
    """
    (w1, b1), (w2, b2), (w3, b3), (w4, b4) = params
    B = x.shape[0]
    TILE_B = min(tile_b, B)          # <256: whole batch is one (legal) block
    grid = (pl.cdiv(B, TILE_B),)

    def batch_spec(feat):
        return pl.BlockSpec((TILE_B, feat), lambda i: (i, 0))

    def resident_spec(arr):
        return pl.BlockSpec(arr.shape, lambda i: (0, 0))

    operands = [x]
    in_specs = [batch_spec(IN_F)]
    if training:
        if dropout_key is None:
            raise ValueError("training=True requires dropout_key")
        m1, m2, m3 = make_dropout_masks(dropout_key, B)
        operands += [m1, m2, m3]
        in_specs += [batch_spec(H1), batch_spec(H2), batch_spec(H3)]
    operands += [w1, b1, w2, b2, w3, b3, w4, b4]
    in_specs += [resident_spec(a) for a in (w1, b1, w2, b2, w3, b3, w4, b4)]

    out_padded = pl.pallas_call(
        functools.partial(_dqn_kernel, training),
        out_shape=jax.ShapeDtypeStruct((B, OUT_PAD), jnp.float32),
        grid=grid,
        in_specs=in_specs,
        out_specs=pl.BlockSpec((TILE_B, OUT_PAD), lambda i: (i, 0)),
        compiler_params=pltpu.CompilerParams(
            dimension_semantics=("parallel",)),
    )(*operands)
    return out_padded[:, :N_OUT]


def init_params(key):
    """nn.Linear-style init: U(-1/sqrt(fan_in), 1/sqrt(fan_in)).

    Weights stored (in, out) as bf16; biases (1, out) f32.
    Last layer is zero-padded to 128 out-features for lane-dense stores.
    """
    dims = [(IN_F, H1), (H1, H2), (H2, H3), (H3, N_OUT)]
    params = []
    for (fan_in, fan_out) in dims:
        key, kw, kb = jax.random.split(key, 3)
        bound = 1.0 / (fan_in ** 0.5)
        w = jax.random.uniform(kw, (fan_in, fan_out), jnp.float32, -bound, bound)
        b = jax.random.uniform(kb, (1, fan_out), jnp.float32, -bound, bound)
        if fan_out == N_OUT:
            w = jnp.pad(w, ((0, 0), (0, OUT_PAD - N_OUT)))
            b = jnp.pad(b, ((0, 0), (0, OUT_PAD - N_OUT)))
        params.append((w.astype(jnp.bfloat16), b))
    return params


def ref_forward(x, params, masks=None):
    """Plain-JAX reference mirroring the kernel's dtype path."""
    (w1, b1), (w2, b2), (w3, b3), (w4, b4) = params
    h = x
    for idx, (w, b) in enumerate(((w1, b1), (w2, b2), (w3, b3))):
        h = jnp.dot(h.astype(jnp.bfloat16), w,
                    preferred_element_type=jnp.float32) + b
        h = jnp.maximum(h, 0.0)
        if masks is not None:
            h = h * masks[idx].astype(jnp.float32)
    h = jnp.dot(h.astype(jnp.bfloat16), w4,
                preferred_element_type=jnp.float32) + b4
    return h[:, :N_OUT]


if __name__ == "__main__":
    key = jax.random.PRNGKey(0)
    key, xkey, dkey = jax.random.split(key, 3)

    B = 8
    x = jax.random.normal(xkey, (B, 6), dtype=jnp.float32)
    params = init_params(key)

    # Inference-mode forward (dropout disabled).
    out_eval = dqn_forward(x, params, training=False)
    jax.block_until_ready(out_eval)

    # Training-mode forward (matches F.dropout default training=True).
    out_train = dqn_forward(x, params, dropout_key=dkey, training=True)
    jax.block_until_ready(out_train)

    # References (same masks are reproduced deterministically from dkey).
    masks = make_dropout_masks(dkey, B)
    ref_eval = ref_forward(x, params, None)
    ref_train = ref_forward(x, params, masks)

    assert out_eval.shape == (B, N_OUT)
    assert out_train.shape == (B, N_OUT)
    assert jnp.allclose(out_eval, ref_eval, atol=1e-2, rtol=1e-2)
    assert jnp.allclose(out_train, ref_train, atol=1e-2, rtol=1e-2)

    print("KERNEL_OK")
</pallas_src>

<mosaic_0001>
module attributes {stable_mosaic.version = 11 : i64} {
  func.func @_dqn_kernel(%arg0: i32, %arg1: memref<8x6xf32, #tpu.memory_space<vmem>>, %arg2: memref<6x128xbf16, #tpu.memory_space<vmem>>, %arg3: memref<1x128xf32, #tpu.memory_space<vmem>>, %arg4: memref<128x256xbf16, #tpu.memory_space<vmem>>, %arg5: memref<1x256xf32, #tpu.memory_space<vmem>>, %arg6: memref<256x64xbf16, #tpu.memory_space<vmem>>, %arg7: memref<1x64xf32, #tpu.memory_space<vmem>>, %arg8: memref<64x128xbf16, #tpu.memory_space<vmem>>, %arg9: memref<1x128xf32, #tpu.memory_space<vmem>>, %arg10: memref<8x128xf32, #tpu.memory_space<vmem>>) attributes {dimension_semantics = [#tpu.dimension_semantics<parallel>], iteration_bounds = array<i64: 1>, scalar_prefetch = 0 : i64, scratch_operands = 0 : i64, tpu.core_type = #tpu.core_type<tc>, window_params = [{transform_indices = @transform_0, window_bounds = array<i64: 8, 6>}, {pipeline_mode = #tpu.pipeline_mode<synchronous>, transform_indices = @transform_1, window_bounds = array<i64: 6, 128>}, {pipeline_mode = #tpu.pipeline_mode<synchronous>, transform_indices = @transform_2, window_bounds = array<i64: 1, 128>}, {pipeline_mode = #tpu.pipeline_mode<synchronous>, transform_indices = @transform_3, window_bounds = array<i64: 128, 256>}, {pipeline_mode = #tpu.pipeline_mode<synchronous>, transform_indices = @transform_4, window_bounds = array<i64: 1, 256>}, {pipeline_mode = #tpu.pipeline_mode<synchronous>, transform_indices = @transform_5, window_bounds = array<i64: 256, 64>}, {pipeline_mode = #tpu.pipeline_mode<synchronous>, transform_indices = @transform_6, window_bounds = array<i64: 1, 64>}, {pipeline_mode = #tpu.pipeline_mode<synchronous>, transform_indices = @transform_7, window_bounds = array<i64: 64, 128>}, {pipeline_mode = #tpu.pipeline_mode<synchronous>, transform_indices = @transform_8, window_bounds = array<i64: 1, 128>}, {transform_indices = @transform_9, window_bounds = array<i64: 8, 128>}]} {
    %c0 = arith.constant 0 : index
    %c0_0 = arith.constant 0 : index
    %0 = vector.load %arg1[%c0, %c0_0] : memref<8x6xf32, #tpu.memory_space<vmem>>, vector<8x6xf32>
    %1 = arith.truncf %0 : vector<8x6xf32> to vector<8x6xbf16>
    %c0_1 = arith.constant 0 : index
    %c0_2 = arith.constant 0 : index
    %2 = vector.load %arg2[%c0_1, %c0_2] : memref<6x128xbf16, #tpu.memory_space<vmem>>, vector<6x128xbf16>
    %cst = arith.constant dense<0.000000e+00> : vector<8x128xf32>
    %3 = tpu.matmul %1, %2, %cst {dimension_numbers = #tpu.dot_dimension_numbers<[1], [0], [0], [1], [0, 0, 1, 1], [], []>} : vector<8x6xbf16>, vector<6x128xbf16>, vector<8x128xf32> -> vector<8x128xf32>
    %c0_3 = arith.constant 0 : index
    %c0_4 = arith.constant 0 : index
    %4 = vector.load %arg3[%c0_3, %c0_4] : memref<1x128xf32, #tpu.memory_space<vmem>>, vector<1x128xf32>
    %5 = vector.broadcast %4 : vector<1x128xf32> to vector<8x128xf32>
    %6 = arith.addf %3, %5 : vector<8x128xf32>
    %cst_5 = arith.constant 0.000000e+00 : f32
    %7 = vector.broadcast %cst_5 : f32 to vector<8x128xf32>
    %8 = arith.maximumf %6, %7 : vector<8x128xf32>
    %9 = arith.truncf %8 : vector<8x128xf32> to vector<8x128xbf16>
    %c0_6 = arith.constant 0 : index
    %c0_7 = arith.constant 0 : index
    %10 = vector.load %arg4[%c0_6, %c0_7] : memref<128x256xbf16, #tpu.memory_space<vmem>>, vector<128x256xbf16>
    %cst_8 = arith.constant dense<0.000000e+00> : vector<8x256xf32>
    %11 = tpu.matmul %9, %10, %cst_8 {dimension_numbers = #tpu.dot_dimension_numbers<[1], [0], [0], [1], [0, 0, 1, 1], [], []>} : vector<8x128xbf16>, vector<128x256xbf16>, vector<8x256xf32> -> vector<8x256xf32>
    %c0_9 = arith.constant 0 : index
    %c0_10 = arith.constant 0 : index
    %12 = vector.load %arg5[%c0_9, %c0_10] : memref<1x256xf32, #tpu.memory_space<vmem>>, vector<1x256xf32>
    %13 = vector.broadcast %12 : vector<1x256xf32> to vector<8x256xf32>
    %14 = arith.addf %11, %13 : vector<8x256xf32>
    %cst_11 = arith.constant 0.000000e+00 : f32
    %15 = vector.broadcast %cst_11 : f32 to vector<8x256xf32>
    %16 = arith.maximumf %14, %15 : vector<8x256xf32>
    %17 = arith.truncf %16 : vector<8x256xf32> to vector<8x256xbf16>
    %c0_12 = arith.constant 0 : index
    %c0_13 = arith.constant 0 : index
    %18 = vector.load %arg6[%c0_12, %c0_13] : memref<256x64xbf16, #tpu.memory_space<vmem>>, vector<256x64xbf16>
    %cst_14 = arith.constant dense<0.000000e+00> : vector<8x64xf32>
    %19 = tpu.matmul %17, %18, %cst_14 {dimension_numbers = #tpu.dot_dimension_numbers<[1], [0], [0], [1], [0, 0, 1, 1], [], []>} : vector<8x256xbf16>, vector<256x64xbf16>, vector<8x64xf32> -> vector<8x64xf32>
    %c0_15 = arith.constant 0 : index
    %c0_16 = arith.constant 0 : index
    %20 = vector.load %arg7[%c0_15, %c0_16] : memref<1x64xf32, #tpu.memory_space<vmem>>, vector<1x64xf32>
    %21 = vector.broadcast %20 : vector<1x64xf32> to vector<8x64xf32>
    %22 = arith.addf %19, %21 : vector<8x64xf32>
    %cst_17 = arith.constant 0.000000e+00 : f32
    %23 = vector.broadcast %cst_17 : f32 to vector<8x64xf32>
    %24 = arith.maximumf %22, %23 : vector<8x64xf32>
    %25 = arith.truncf %24 : vector<8x64xf32> to vector<8x64xbf16>
    %c0_18 = arith.constant 0 : index
    %c0_19 = arith.constant 0 : index
    %26 = vector.load %arg8[%c0_18, %c0_19] : memref<64x128xbf16, #tpu.memory_space<vmem>>, vector<64x128xbf16>
    %cst_20 = arith.constant dense<0.000000e+00> : vector<8x128xf32>
    %27 = tpu.matmul %25, %26, %cst_20 {dimension_numbers = #tpu.dot_dimension_numbers<[1], [0], [0], [1], [0, 0, 1, 1], [], []>} : vector<8x64xbf16>, vector<64x128xbf16>, vector<8x128xf32> -> vector<8x128xf32>
    %c0_21 = arith.constant 0 : index
    %c0_22 = arith.constant 0 : index
    %28 = vector.load %arg9[%c0_21, %c0_22] : memref<1x128xf32, #tpu.memory_space<vmem>>, vector<1x128xf32>
    %29 = vector.broadcast %28 : vector<1x128xf32> to vector<8x128xf32>
    %30 = arith.addf %27, %29 : vector<8x128xf32>
    %c0_23 = arith.constant 0 : index
    %c0_24 = arith.constant 0 : index
    %31 = vector.load %arg10[%c0_23, %c0_24] : memref<8x128xf32, #tpu.memory_space<vmem>>, vector<8x128xf32>
    tpu.vector_store %arg10[%c0_23, %c0_24], %30 {strides = array<i32>} : memref<8x128xf32, #tpu.memory_space<vmem>>, vector<8x128xf32>,
    return
  }
  func.func @transform_0(%arg0: i32) -> (i32, i32) {
    %c0_i32 = arith.constant 0 : i32
    %c0_i32_0 = arith.constant 0 : i32
    return %arg0, %c0_i32 : i32, i32
  }
  func.func @transform_1(%arg0: i32) -> (i32, i32) {
    %c0_i32 = arith.constant 0 : i32
    %c0_i32_0 = arith.constant 0 : i32
    %c0_i32_1 = arith.constant 0 : i32
    return %c0_i32, %c0_i32_0 : i32, i32
  }
  func.func @transform_2(%arg0: i32) -> (i32, i32) {
    %c0_i32 = arith.constant 0 : i32
    %c0_i32_0 = arith.constant 0 : i32
    %c0_i32_1 = arith.constant 0 : i32
    return %c0_i32, %c0_i32_0 : i32, i32
  }
  func.func @transform_3(%arg0: i32) -> (i32, i32) {
    %c0_i32 = arith.constant 0 : i32
    %c0_i32_0 = arith.constant 0 : i32
    %c0_i32_1 = arith.constant 0 : i32
    return %c0_i32, %c0_i32_0 : i32, i32
  }
  func.func @transform_4(%arg0: i32) -> (i32, i32) {
    %c0_i32 = arith.constant 0 : i32
    %c0_i32_0 = arith.constant 0 : i32
    %c0_i32_1 = arith.constant 0 : i32
    return %c0_i32, %c0_i32_0 : i32, i32
  }
  func.func @transform_5(%arg0: i32) -> (i32, i32) {
    %c0_i32 = arith.constant 0 : i32
    %c0_i32_0 = arith.constant 0 : i32
    %c0_i32_1 = arith.constant 0 : i32
    return %c0_i32, %c0_i32_0 : i32, i32
  }
  func.func @transform_6(%arg0: i32) -> (i32, i32) {
    %c0_i32 = arith.constant 0 : i32
    %c0_i32_0 = arith.constant 0 : i32
    %c0_i32_1 = arith.constant 0 : i32
    return %c0_i32, %c0_i32_0 : i32, i32
  }
  func.func @transform_7(%arg0: i32) -> (i32, i32) {
    %c0_i32 = arith.constant 0 : i32
    %c0_i32_0 = arith.constant 0 : i32
    %c0_i32_1 = arith.constant 0 : i32
    return %c0_i32, %c0_i32_0 : i32, i32
  }
  func.func @transform_8(%arg0: i32) -> (i32, i32) {
    %c0_i32 = arith.constant 0 : i32
    %c0_i32_0 = arith.constant 0 : i32
    %c0_i32_1 = arith.constant 0 : i32
    return %c0_i32, %c0_i32_0 : i32, i32
  }
  func.func @transform_9(%arg0: i32) -> (i32, i32) {
    %c0_i32 = arith.constant 0 : i32
    %c0_i32_0 = arith.constant 0 : i32
    return %arg0, %c0_i32 : i32, i32
  }
}

</mosaic_0001>

<bundles_post_ra>
// kernel: tpu_custom_call.1
= control target key start
LH: loop header
LB: loop body
LE: loop exit
PB: predicated region body
PF: predicated region fallthrough
CT: control target
= control target key end

     0   :  { %vm48_vm0 = vcmask 1042432   ;;  %v682_v2 = vmov 0.0   ;;  %vm683_vm1 = vmmov 0   ;;  %vm44_vm2 = vcmask 48128   ;;  %s883_s0 = inlined_call_operand.vmem [shape: f32[8,6], index: 0, kind: input, shape index: {}]   ;;  %s884_s1 = inlined_call_operand.vmem [shape: bf16[6,128], index: 1, kind: input, shape index: {}]   ;;  %s885_s2 = inlined_call_operand.vmem [shape: f32[1,128], index: 2, kind: input, shape index: {}]   ;;  %s886_s3 = inlined_call_operand.vmem [shape: bf16[128,256], index: 3, kind: input, shape index: {}]   ;;  %s887_s4 = inlined_call_operand.vmem [shape: f32[1,256], index: 4, kind: input, shape index: {}]   ;;  %s888_s5 = inlined_call_operand.vmem [shape: bf16[256,64], index: 5, kind: input, shape index: {}]   ;;  %s889_s6 = inlined_call_operand.vmem [shape: f32[1,64], index: 6, kind: input, shape index: {}]   ;;  %s890_s7 = inlined_call_operand.vmem [shape: bf16[64,128], index: 7, kind: input, shape index: {}]   ;;  %s891_s8 = inlined_call_operand.vmem [shape: f32[1,128], index: 8, kind: input, shape index: {}]   ;;  %s892_s9 = inlined_call_operand.hbm [shape: f32[8,128], index: 9, kind: output, shape index: {}]  }
   0x1   :  { %v36_v0 = vld [vmem:[%s884_s1] sm:$0x7]  ;;  %592 = vmatprep.subr.bf16.mxu0 %v682_v2  ;;  %594 = vmatprep.mubr.msk.bf16.mxu0 %vm683_vm1, %v682_v2  ;;  %v614_v5 = vld [vmem:[%s886_s3 + $0x4] ss:$8 sps:$4 sm:$0xff]   ;;  %v617_v7 = vld [vmem:[%s886_s3 + $0x14] ss:$8 sps:$4 sm:$0xff]  }
   0x2   :  { %v34_v1 = vld [vmem:[%s883_s0] sm:$0xff]  ;;  %v50_v3 = vsel %vm48_vm0, %v36_v0, 0  ;;  %202 = vmatprep.subr.bf16.mxu1 %v614_v5  ;;  %v619_v8 = vld [vmem:[%s886_s3 + $0x10] ss:$8 sps:$4 sm:$0xff]   ;;  %v623_v11 = vld [vmem:[%s886_s3 + $0x34] ss:$8 sps:$4 sm:$0xff]  }
   0x3   :  { %v35_v4 = vpack.c.bf16 %v34_v1, %v34_v1  ;;  %593 = vmatpush3.bf16.msra.mxu0 %v50_v3  ;;  %v616_v6 = vld [vmem:[%s886_s3] ss:$8 sps:$4 sm:$0xff]   ;;  %v620_v9 = vld [vmem:[%s886_s3 + $0x24] ss:$8 sps:$4 sm:$0xff]   ;;  %v625_v12 = vld [vmem:[%s886_s3 + $0x30] ss:$8 sps:$4 sm:$0xff]  }
   0x4   :  { %203 = vmatpush1.bf16.msra.mxu1 %v616_v6  ;;  %v622_v10 = vld [vmem:[%s886_s3 + $0x20] ss:$8 sps:$4 sm:$0xff]   ;;  %v626_v13 = vld [vmem:[%s886_s3 + $0x44] ss:$8 sps:$4 sm:$0xff]   ;;  %v629_v15 = vld [vmem:[%s886_s3 + $0x54] ss:$8 sps:$4 sm:$0xff]  }
   0x5   :  { %204 = vmatprep.subr.bf16.mxu1 %v617_v7  ;;  %v628_v14 = vld [vmem:[%s886_s3 + $0x40] ss:$8 sps:$4 sm:$0xff]   ;;  %v631_v16 = vld [vmem:[%s886_s3 + $0x50] ss:$8 sps:$4 sm:$0xff]   ;;  %v632_v17 = vld [vmem:[%s886_s3 + $0x64] ss:$8 sps:$4 sm:$0xff]  }
   0x6   :  { %595 = vmatmul.mubr.msk.bf16.vlgmr.msra.gmra.mrb[0].mxu0 %vm44_vm2, %v35_v4 }
   0x8   :  { %205 = vmatpush1.bf16.msra.mxu1 %v619_v8 }
   0x9   :  { %206 = vmatprep.subr.bf16.mxu1 %v620_v9 }
   0xc   :  { %207 = vmatpush1.bf16.msra.mxu1 %v622_v10 }
   0xd   :  { %208 = vmatprep.subr.bf16.mxu1 %v623_v11 }
  0x10   :  { %209 = vmatpush1.bf16.msra.mxu1 %v625_v12 }
  0x11   :  { %210 = vmatprep.subr.bf16.mxu1 %v626_v13 }
  0x14   :  { %211 = vmatpush1.bf16.msra.mxu1 %v628_v14 }
  0x15   :  { %212 = vmatprep.subr.bf16.mxu1 %v629_v15 }
  0x18   :  { %213 = vmatpush1.bf16.msra.mxu1 %v631_v16 }
  0x19   :  { %14 = vsyncpa [#allocation3], 0  ;;  %214 = vmatprep.subr.bf16.mxu1 %v632_v17  ;;  %v634_v18 = vld [vmem:[%s886_s3 + $0x60] ss:$8 sps:$4 sm:$0xff]   ;;  %v635_v19 = vld [vmem:[%s886_s3 + $0x74] ss:$8 sps:$4 sm:$0xff]   ;;  %v112_v48 = vlaneseq }
  0x1a   :  { %v637_v20 = vld [vmem:[%s886_s3 + $0x70] ss:$8 sps:$4 sm:$0xff]   ;;  %v684_v21 = vmov 0   ;;  %v638_v22 = vld [vmem:[%s888_s5 + $0x40] sm:$0xff]   ;;  %v640_v24 = vld [vmem:[%s888_s5 + $0x48] sm:$0xff]   ;;  %vm463_vm3 = vcmask 523264  }
  0x1b   :  { %234 = vmatprep.mubr.bf16.mxu1 %v684_v21  ;;  %v639_v23 = vld [vmem:[%s888_s5] sm:$0xff]   ;;  %565 = vmatprep.subr.bf16.mxu0 %v638_v22  ;;  %v641_v25 = vld [vmem:[%s888_s5 + $0x8] sm:$0xff]   ;;  %v642_v26 = vld [vmem:[%s888_s5 + $0x50] sm:$0xff]   ;;  %v113_v49 = vshrl.u32 %v112_v48, 7 }
  0x1c   :  { %215 = vmatpush1.bf16.msra.mxu1 %v634_v18  ;;  %566 = vmatpush3.bf16.msra.mxu0 %v639_v23  ;;  %v643_v27 = vld [vmem:[%s888_s5 + $0x10] sm:$0xff]   ;;  %v644_v28 = vld [vmem:[%s888_s5 + $0x58] sm:$0xff]   ;;  %v646_v30 = vld [vmem:[%s888_s5 + $0x60] sm:$0xff]  }
  0x1d   :  { %216 = vmatprep.subr.bf16.mxu1 %v635_v19  ;;  %567 = vmatprep.subr.bf16.mxu0 %v640_v24  ;;  %v645_v29 = vld [vmem:[%s888_s5 + $0x18] sm:$0xff]   ;;  %v647_v31 = vld [vmem:[%s888_s5 + $0x20] sm:$0xff]   ;;  %v648_v32 = vld [vmem:[%s888_s5 + $0x68] sm:$0xff]   ;;  %v114_v50 = vsub.s32 0, %v113_v49  ;;  %v118_v52 = vsub.s32 1, %v113_v49 }
  0x1e   :  { %v649_v33 = vld [vmem:[%s888_s5 + $0x28] sm:$0xff]   ;;  %v522_v34 = vld [vmem:[%s885_s2] ss:$0 sm:$0xff]  ;;  %v650_v42 = vld [vmem:[%s888_s5 + $0x70] sm:$0xff]  }
  0x1f   :  { %v651_v43 = vld [vmem:[%s888_s5 + $0x30] sm:$0xff]   ;;  %v652_v44 = vld [vmem:[%s888_s5 + $0x78] sm:$0xff]   ;;  %v654_v46 = vld [vmem:[%s890_s7] sm:$0xff]  }
  0x20   :  { %217 = vmatpush1.bf16.msra.mxu1 %v637_v20  ;;  %568 = vmatpush3.bf16.msra.mxu0 %v641_v25  ;;  %v653_v45 = vld [vmem:[%s888_s5 + $0x38] sm:$0xff]   ;;  %v655_v47 = vld [vmem:[%s890_s7 + $0x8] sm:$0xff]   ;;  %v110_v51 = vld [vmem:[%s887_s4] sm:$0x3] }
  0x21   :  { %598 = vmatprep.subr.bf16.mxu1 %v682_v2  ;;  %569 = vmatprep.subr.bf16.mxu0 %v642_v26  ;;  %v115_v53 = vrot.slane %v110_v51, %v114_v50  ;;  %v119_v54 = vrot.slane %v110_v51, %v118_v52  ;;  %v656_v1 = vld [vmem:[%s890_s7 + $0x10] sm:$0xff]   ;;  %v657_v3 = vld [vmem:[%s890_s7 + $0x18] sm:$0xff]   ;;  %v540_v5 = vld [vmem:[%s889_s6] ss:$0 sm:$0xff]  ;;  %s685_s7 = smov [#allocation2]  }
  0x22   :  { %s514_s17 = sshll.u32 %s685_s7, 4  ;;  %s515_s17 = int_to_ptr.vmem [resolvable:$true] %s514_s17 }
  0x23   :  { %s658_s6 = scalar_lea.vmem %s515_s17, 128  ;;  %p663_p1 = scmp.lt.s32.totalorder %s515_s17, %s515_s17 }
  0x24   :  { %570 = vmatpush3.bf16.msra.mxu0 %v643_v27  ;;  %p659_p0 = scmp.ne.s32.totalorder %s515_s17, %s658_s6  ;;  %p664_p2 = scmp.lt.s32.totalorder %s658_s6, %s658_s6 }
  0x25   :  { %571 = vmatprep.subr.bf16.mxu0 %v644_v28 }
  0x26   :  { %p665_p3 = por %p664_p2, %p663_p1 }
  0x28   :  { %572 = vmatpush3.bf16.msra.mxu0 %v645_v29  ;;  %p666_p4 = pnand %p665_p3, %p659_p0 }
  0x29   :  { %573 = vmatprep.subr.bf16.mxu0 %v646_v30 }
  0x2c   :  { %574 = vmatpush3.bf16.msra.mxu0 %v647_v31 }
  0x2d   :  { %575 = vmatprep.subr.bf16.mxu0 %v648_v32 }
  0x30   :  { %576 = vmatpush3.bf16.msra.mxu0 %v649_v33 }
  0x31   :  { %577 = vmatprep.subr.bf16.mxu0 %v650_v42 }
  0x34   :  { %578 = vmatpush3.bf16.msra.mxu0 %v651_v43 }
  0x35   :  { %579 = vmatprep.subr.bf16.mxu0 %v652_v44 }
  0x38   :  { %580 = vmatpush3.bf16.msra.mxu0 %v653_v45 }
  0xd9   :  { %v86_v35 = vpop.f32.mrb[0].mxu0 }
  0xda   :  { %v87_v36 = vadd.f32 %v522_v34, %v86_v35  ;;  %v596_v37 = vpop.f32.mrb[1].mxu0 }
  0xdb   :  { %v89_v38 = vpop.f32.mrb[2].mxu0 }
  0xdc   :  { %v92_v39 = vmax.f32 %v87_v36, 0.0  ;;  %v597_v40 = vpop.f32.mrb[3].mxu0 }
  0xde   :  { %v93_v41 = vpack.c.bf16 %v92_v39, %v92_v39 }
  0xe0   :  { %235 = vmatmul.mubr.bf16.vlgmr.msra.gmra.mrb[0].mxu1 %v93_v41 }
  0xe1   :  { %606 = vmatprep.mubr.msk.bf16.mxu1 %vm683_vm1, %v682_v2  ;;  %599 = vmatpush3.bf16.msra.mxu1 %v654_v46 }
  0xe2   :  { %600 = vmatprep.subr.bf16.mxu1 %v682_v2 }
  0xe5   :  { %601 = vmatpush3.bf16.msra.mxu1 %v655_v47 }
  0xe6   :  { %602 = vmatprep.subr.bf16.mxu1 %v682_v2 }
  0xe9   :  { %603 = vmatpush3.bf16.msra.mxu1 %v656_v1 }
  0xea   :  { %604 = vmatprep.subr.bf16.mxu1 %v682_v2  ;;  %v557_v2 = vld [vmem:[%s891_s8] ss:$0 sm:$0xff] }
  0xed   :  { %605 = vmatpush3.bf16.msra.mxu1 %v657_v3 }
 0x1b3   :  { %v236_v55 = vpop.f32.mrb[0].mxu1 }
 0x1b4   :  { %v237_v56 = vadd.f32 %v236_v55, %v115_v53  ;;  %v238_v57 = vpop.f32.mrb[1].mxu1 }
 0x1b5   :  { %v239_v58 = vadd.f32 %v238_v57, %v119_v54  ;;  %v240_v59 = vpop.f32.mrb[2].mxu1 }
 0x1b6   :  { %v243_v60 = vmax.f32 %v237_v56, 0.0  ;;  %v241_v61 = vpop.f32.mrb[3].mxu1 }
 0x1b7   :  { %v244_v62 = vmax.f32 %v239_v58, 0.0 }
 0x1b8   :  { %v245_v0 = vpack.c.bf16 %v243_v60, %v243_v60 }
 0x1b9   :  { %v246_v63 = vpack.c.bf16 %v244_v62, %v244_v62 }
 0x1bb   :  { %414 = vmatprep.mubr.bf16.mxu0 %v246_v63 }
 0x1bc   :  { %415 = vmatmul.mubr.bf16.vlgmr.msra.gmra.mrb[4].mxu0 %v245_v0 }
 0x28f   :  { %v581_v4 = vpop.f32.mrb[4].mxu0 }
 0x290   :  { %v582_v6 = vpop.f32.mrb[5].mxu0 }
 0x291   :  { %v583_v7 = vadd.f32 %v582_v6, %v581_v4  ;;  %v584_v8 = vpop.f32.mrb[6].mxu0 }
 0x292   :  { %v585_v9 = vpop.f32.mrb[7].mxu0 }
 0x293   :  { %v417_v10 = vadd.f32 %v583_v7, %v540_v5 }
 0x295   :  { %v422_v11 = vmax.f32 %v417_v10, 0.0 }
 0x297   :  { %v423_v12 = vpack.c.bf16 %v422_v11, %v422_v11 }
 0x299   :  { %607 = vmatmul.mubr.msk.bf16.vlgmr.msra.gmra.mrb[4].mxu1 %vm463_vm3, %v423_v12 }
 0x36c   :  { %v501_v13 = vpop.f32.mrb[4].mxu1 }
 0x36d   :  { %v502_v14 = vadd.f32 %v557_v2, %v501_v13  ;;  %v608_v15 = vpop.f32.mrb[5].mxu1 }
 0x36e   :  { %v504_v16 = vpop.f32.mrb[6].mxu1 }
 0x36f   :  { %507 = vst [vmem:[#allocation2] sm:$0xff] %v502_v14  ;;  %v609_v17 = vpop.f32.mrb[7].mxu1 }
 0x370   :  { %669 = shalt.err (!%p666_p4)
}
 0x371   :  { %s670_s8 = scalar_lea.hbm %s892_s9, 128 }
 0x372   :  { %p671_p5 = scmp.ne.s32.totalorder %s892_s9, %s670_s8  ;;  %p674_p6 = scmp.lt.u32.totalorder %s670_s8, %s892_s9 }
 0x374   :  { %p676_p7 = pnand %p674_p6, %p671_p5 }
 0x376   :  { %679 = shalt.err (!%p676_p7)
}
 0x377   :  { %517 = dma.vmem_to_hbm [thread:$0]  %s515_s17, 128, %s892_s9, [#allocation3]  }
 0x378   :  { %680 = dma.done.wait [#allocation3], 128  }
 0x379   :  { %681 = vsyncadd [#allocation3], 4294967168 }
 0x37a   :  { %521 = vsyncpa [#allocation3], 1 }

</bundles_post_ra>
